<compile_context>
chip_gen: v7x
topology: tpu7x:2x2x1
jax: 0.10.0
libtpu: 0.0.40
codegen_flags: <defaults>
</compile_context>

<pallas_src>
import functools

import jax
import jax.numpy as jnp
from jax.experimental import pallas as pl
from jax.experimental.pallas import tpu as pltpu


_MIB = 1024 * 1024
_VMEM_HEADROOM = 8 * _MIB      # slack for compiler-internal scratch


# ----------------------------- helpers --------------------------------------

def _round_up(x, m):
    return ((x + m - 1) // m) * m


def _pad2d(a, rows, cols):
    return jnp.pad(a, ((0, rows - a.shape[0]), (0, cols - a.shape[1])))


def _pick_tile(n):
    if n >= 2048:
        return 1024
    if n >= 1024:
        return 512
    if n >= 512:
        return 256
    return 128


def _vmem_cap_bytes():
    """Per-core VMEM capacity (64 MiB on v7x, 128 MiB on v5e/v6e)."""
    try:
        return int(pltpu.get_tpu_info().vmem_capacity_bytes)
    except Exception:
        return 64 * _MIB           # assume the smallest (v7x) budget if query fails


def _a_block_spec(tile, nk):
    """A-tile spec; 3-deep buffered when the k loop is long enough to benefit."""
    idx = lambda i, k: (i, k)
    if nk >= 3:
        try:
            return pl.BlockSpec((tile, tile), idx, pipeline_mode=pl.Buffered(3))
        except TypeError:          # older jax without pipeline_mode kwarg
            pass
    return pl.BlockSpec((tile, tile), idx)


def _layer_budget(tile, np_, fm_pad, fout_pad, g_pad, m_resident, apply_w):
    """VMEM working set (bytes) of one _gcn_layer_call, incl. pipeline buffers."""
    b = 3 * tile * tile * 2                                              # A (bf16)
    b += (2 * np_ * fm_pad * 2) if m_resident else (2 * tile * fm_pad * 2)  # M
    if apply_w:
        b += 2 * fm_pad * fout_pad * 2                                   # W (bf16)
    b += 2 * fout_pad * 4                                                # bias
    b += 2 * g_pad * tile * 2                                            # pool cols
    b += 2 * tile * fout_pad * 2                                         # h out tile
    b += 2 * g_pad * fout_pad * 4                                        # embp tile
    b += tile * fm_pad * 4                                               # f32 acc
    return b


# ----------------------------- Pallas kernels -------------------------------

def _gcn_layer_kernel(apply_w, m_resident, tile, a_ref, m_ref, *refs):
    """Tiled GCNConv: acc += A_tile @ M_block; finalize = (W) + bias + ReLU + pool.

    a_ref:   (tm, tk)         bf16 normalized-adjacency tile
    m_ref:   (N, Fm)|(tk, Fm) bf16 X (W applied after) or X@W (W applied before)
    w_ref:   (Fm, Fo)         bf16 layer weight (only when apply_w)
    b_ref:   (1, Fo)          f32 bias
    p_ref:   (Gp, tm)         bf16 mean-pool columns for this row tile
    h_ref:   (tm, Fo)         bf16 output node features (post-ReLU)
    embp_ref:(1, Gp, Fo)      f32 partial pooled embedding for this row tile
    acc_ref: (tm, Fm)         f32 accumulator scratch
    """
    if apply_w:
        w_ref, b_ref, p_ref, h_ref, embp_ref, acc_ref = refs
    else:
        b_ref, p_ref, h_ref, embp_ref, acc_ref = refs
        w_ref = None

    k = pl.program_id(1)

    @pl.when(k == 0)
    def _():
        acc_ref[...] = jnp.zeros_like(acc_ref)

    if m_resident:
        start = pl.multiple_of(k * tile, tile)
        m = m_ref[pl.ds(start, tile), :]       # M stays resident; slice the k block
    else:
        m = m_ref[...]

    acc_ref[...] += jnp.dot(a_ref[...], m, preferred_element_type=jnp.float32)

    @pl.when(k == pl.num_programs(1) - 1)
    def _():
        h = acc_ref[...]
        if apply_w:
            # bf16 x bf16 epilogue matmul (f32 accumulation on the MXU).
            h = jnp.dot(h.astype(jnp.bfloat16), w_ref[...],
                        preferred_element_type=jnp.float32)
        h = jnp.maximum(h + b_ref[...], 0.0)     # bias + ReLU once per row tile
        h_bf = h.astype(jnp.bfloat16)
        h_ref[...] = h_bf
        # Padded node rows give relu(bias); harmless: their A / pool columns are 0.
        embp_ref[0] = jnp.dot(p_ref[...], h_bf, preferred_element_type=jnp.float32)


def _project_kernel(x_ref, w_ref, o_ref):
    """M = X @ W (used when F_in > F_out, so the A contraction runs at width F_out)."""
    o_ref[...] = jnp.dot(x_ref[...], w_ref[...],
                         preferred_element_type=jnp.float32).astype(o_ref.dtype)


# ----------------------------- pallas_call wrappers --------------------------

def _gcn_layer_call(a_pad, m, w_bf, b_pad, pool_bf, *, tile, f_out_pad,
                    apply_w, m_resident, vmem_limit):
    np_ = a_pad.shape[0]
    fm_pad = m.shape[1]
    g_pad = pool_bf.shape[0]
    ni = np_ // tile
    nk = np_ // tile

    in_specs = [_a_block_spec(tile, nk)]                      # A tile stream
    if m_resident:
        in_specs.append(pl.BlockSpec((np_, fm_pad), lambda i, k: (0, 0)))
    else:
        in_specs.append(pl.BlockSpec((tile, fm_pad), lambda i, k: (k, 0)))
    inputs = [a_pad, m]
    if apply_w:
        in_specs.append(pl.BlockSpec((fm_pad, f_out_pad), lambda i, k: (0, 0)))
        inputs.append(w_bf)
    in_specs += [
        pl.BlockSpec((1, f_out_pad), lambda i, k: (0, 0)),    # bias
        pl.BlockSpec((g_pad, tile), lambda i, k: (0, i)),     # pooling columns
    ]
    inputs += [b_pad, pool_bf]

    out_shape = (
        jax.ShapeDtypeStruct((np_, f_out_pad), jnp.bfloat16),
        jax.ShapeDtypeStruct((ni, g_pad, f_out_pad), jnp.float32),
    )
    out_specs = (
        pl.BlockSpec((tile, f_out_pad), lambda i, k: (i, 0)),
        pl.BlockSpec((1, g_pad, f_out_pad), lambda i, k: (i, 0, 0)),
    )

    return pl.pallas_call(
        functools.partial(_gcn_layer_kernel, apply_w, m_resident, tile),
        out_shape=out_shape,
        grid_spec=pltpu.PrefetchScalarGridSpec(
            num_scalar_prefetch=0,
            grid=(ni, nk),
            in_specs=in_specs,
            out_specs=out_specs,
            scratch_shapes=[pltpu.VMEM((tile, fm_pad), jnp.float32)],
        ),
        compiler_params=pltpu.CompilerParams(
            dimension_semantics=("parallel", "arbitrary"),
            vmem_limit_bytes=vmem_limit,
        ),
    )(*inputs)


def _project_call(x_pad, w_bf, *, tile, vmem_limit):
    np_, fin_pad = x_pad.shape
    fout_pad = w_bf.shape[1]
    return pl.pallas_call(
        _project_kernel,
        out_shape=jax.ShapeDtypeStruct((np_, fout_pad), jnp.bfloat16),
        grid_spec=pltpu.PrefetchScalarGridSpec(
            num_scalar_prefetch=0,
            grid=(np_ // tile,),
            in_specs=[pl.BlockSpec((tile, fin_pad), lambda i: (i, 0)),
                      pl.BlockSpec((fin_pad, fout_pad), lambda i: (0, 0))],
            out_specs=pl.BlockSpec((tile, fout_pad), lambda i: (i, 0)),
        ),
        compiler_params=pltpu.CompilerParams(
            dimension_semantics=("parallel",),
            vmem_limit_bytes=vmem_limit,
        ),
    )(x_pad, w_bf)


# ------------------------------- JAX glue -----------------------------------

def build_norm_adj(edge_index, num_nodes):
    """Dense D^-1/2 (A + I) D^-1/2 (edge_weight=None, add_self_loops, normalize)."""
    src, dst = edge_index[0], edge_index[1]
    a = jnp.zeros((num_nodes, num_nodes), jnp.float32)
    a = a.at[dst, src].add(1.0)                       # message j -> i in row i
    a = a + jnp.eye(num_nodes, dtype=jnp.float32)     # self loops
    deg = a.sum(axis=1)
    d_inv_sqrt = jnp.where(deg > 0, 1.0 / jnp.sqrt(deg), 0.0)
    return a * d_inv_sqrt[:, None] * d_inv_sqrt[None, :]


def build_mean_pool(batch, num_graphs, num_nodes):
    """Dense [G, N] matrix implementing global_mean_pool."""
    one_hot = (batch[None, :] == jnp.arange(num_graphs)[:, None]).astype(jnp.float32)
    counts = one_hot.sum(axis=1, keepdims=True)
    return one_hot / jnp.maximum(counts, 1.0)


def init_gcn_params(key, layers_dim):
    """Glorot-uniform weights + zero bias per GCNConv layer."""
    params = []
    for i in range(len(layers_dim) - 1):
        key, sub = jax.random.split(key)
        fan_in, fan_out = layers_dim[i], layers_dim[i + 1]
        limit = jnp.sqrt(6.0 / (fan_in + fan_out))
        w = jax.random.uniform(sub, (fan_in, fan_out), jnp.float32, -limit, limit)
        b = jnp.zeros((1, fan_out), jnp.float32)
        params.append((w, b))
    return params


@functools.partial(jax.jit, static_argnums=(4,))
def gcn_block_forward(params, x, edge_index, batch, num_graphs):
    """GCNBlock.forward (ReLU after every layer); returns per-layer pooled embeddings."""
    n, f_in0 = x.shape
    tile = _pick_tile(n)
    np_ = _round_up(n, tile)
    g_pad = _round_up(num_graphs, 8)           # full sublanes -> unmasked embp stores

    cap = _vmem_cap_bytes()
    cap_limit = max(32 * _MIB, cap - 16 * _MIB)

    # Build Ahat / pool directly into their narrow compute dtypes (fuses under jit).
    a_pad = _pad2d(build_norm_adj(edge_index, n), np_, np_).astype(jnp.bfloat16)
    pool_bf = _pad2d(build_mean_pool(batch, num_graphs, n),
                     g_pad, np_).astype(jnp.bfloat16)

    h_pad = _pad2d(x, np_, _round_up(f_in0, 128)).astype(jnp.bfloat16)

    embeddings = []
    for w, b in params:
        f_in, f_out = w.shape
        fin_pad = _round_up(f_in, 128)
        fout_pad = _round_up(f_out, 128)
        w_bf = _pad2d(w, fin_pad, fout_pad).astype(jnp.bfloat16)
        b_pad = _pad2d(b, 1, fout_pad)

        apply_w = f_in <= f_out                 # contract A at the narrower width
        fm_pad = fin_pad if apply_w else fout_pad

        # Generation-aware VMEM planning: keep M resident when it fits.
        budget_res = _layer_budget(tile, np_, fm_pad, fout_pad, g_pad, True, apply_w)
        m_resident = budget_res + _VMEM_HEADROOM <= cap_limit
        budget = budget_res if m_resident else _layer_budget(
            tile, np_, fm_pad, fout_pad, g_pad, False, apply_w)
        vmem_limit = int(max(16 * _MIB, min(cap_limit, budget + _VMEM_HEADROOM)))

        if apply_w:
            m = h_pad                            # apply W in the kernel epilogue
        else:
            # Project to the narrower F_out first, then contract A.
            m = _project_call(h_pad, w_bf, tile=tile, vmem_limit=vmem_limit)

        h_pad, embp = _gcn_layer_call(
            a_pad, m, w_bf if apply_w else None, b_pad, pool_bf,
            tile=tile, f_out_pad=fout_pad, apply_w=apply_w,
            m_resident=m_resident, vmem_limit=vmem_limit)

        embeddings.append(embp.sum(axis=0)[:num_graphs, :f_out])  # row-tile partials
    return embeddings


def gcn_model_forward(params, graph_batchs):
    """GCNModel.forward: map over graph batches, concatenate per-layer embeddings."""
    num_layers = len(params)
    embedding_batchs = [
        gcn_block_forward(params, g["x"], g["edge_index"], g["batch"], g["num_graphs"])
        for g in graph_batchs
    ]
    return [
        jnp.concatenate([eb[i] for eb in embedding_batchs], axis=0)
        for i in range(num_layers)
    ]


def reference_forward(params, graph_batchs):
    """Pure-JAX f32 reference for correctness checking."""
    num_layers = len(params)
    per_batch = []
    for g in graph_batchs:
        a = build_norm_adj(g["edge_index"], g["x"].shape[0])
        p = build_mean_pool(g["batch"], g["num_graphs"], g["x"].shape[0])
        h = g["x"]
        embs = []
        for w, b in params:
            h = jnp.maximum(a @ h @ w + b, 0.0)
            embs.append(p @ h)
        per_batch.append(embs)
    return [jnp.concatenate([eb[i] for eb in per_batch], axis=0)
            for i in range(num_layers)]


# ------------------------------- demo / main ---------------------------------

def make_ring_edges(num_graphs, nodes_per_graph):
    src, dst = [], []
    for g in range(num_graphs):
        off = g * nodes_per_graph
        for i in range(nodes_per_graph):
            j = (i + 1) % nodes_per_graph
            src += [off + i, off + j]
            dst += [off + j, off + i]
    return jnp.array([src, dst], dtype=jnp.int32)


if __name__ == "__main__":
    key = jax.random.PRNGKey(0)

    layers_dim = [8, 32, 16]          # exercises both W-after-A and W-before-A paths
    num_layers = len(layers_dim) - 1

    key, pkey = jax.random.split(key)
    params = init_gcn_params(pkey, layers_dim)

    # Two "graph batches", each holding 2 graphs of 8 nodes (16 nodes total).
    graphs_per_batch = 2
    nodes_per_graph = 8
    n_nodes = graphs_per_batch * nodes_per_graph
    batch_vec = jnp.repeat(jnp.arange(graphs_per_batch, dtype=jnp.int32),
                           nodes_per_graph)
    edge_index = make_ring_edges(graphs_per_batch, nodes_per_graph)

    graph_batchs = []
    for _ in range(2):
        key, xkey = jax.random.split(key)
        graph_batchs.append({
            "x": jax.random.normal(xkey, (n_nodes, layers_dim[0]), jnp.float32),
            "edge_index": edge_index,
            "batch": batch_vec,
            "num_graphs": graphs_per_batch,
        })

    embeddings = gcn_model_forward(params, graph_batchs)
    embeddings = [jax.block_until_ready(e) for e in embeddings]
    reference = reference_forward(params, graph_batchs)

    assert len(embeddings) == num_layers
    for i, (e, r) in enumerate(zip(embeddings, reference)):
        assert e.shape == (2 * graphs_per_batch, layers_dim[i + 1]), e.shape
        assert jnp.all(jnp.isfinite(e))
        assert jnp.allclose(e, r, atol=5e-2, rtol=5e-2), (
            f"layer {i}: max abs err {jnp.max(jnp.abs(e - r))}")

    print("KERNEL_OK")
</pallas_src>

<mosaic_0001>
module attributes {stable_mosaic.version = 11 : i64} {
  func.func private @main(%arg0: i32) attributes {dimension_semantics = [#tpu.dimension_semantics<core_parallel>], iteration_bounds = array<i64: 2>, tpu.core_type = #tpu.core_type<sc_scalar_subcore>, window_params = []} {
    return
  }
}

module attributes {stable_mosaic.version = 11 : i64} {
  func.func private @main(%arg0: i32) attributes {dimension_semantics = [#tpu.dimension_semantics<core_parallel>], iteration_bounds = array<i64: 2>, tpu.core_type = #tpu.core_type<sc_scalar_subcore>, window_params = []} {
    return
  }
}

module attributes {stable_mosaic.version = 11 : i64} {
  func.func @_gcn_layer_kernel(%arg0: i32, %arg1: i32, %arg2: memref<128x128xbf16, #tpu.memory_space<vmem>>, %arg3: memref<128x128xbf16, #tpu.memory_space<vmem>>, %arg4: memref<1x128xf32, #tpu.memory_space<vmem>>, %arg5: memref<8x128xbf16, #tpu.memory_space<vmem>>, %arg6: memref<128x128xbf16, #tpu.memory_space<vmem>>, %arg7: memref<1x8x128xf32, #tpu.memory_space<vmem>>, %arg8: memref<128x128xf32, #tpu.memory_space<vmem>>) attributes {dimension_semantics = [#tpu.dimension_semantics<parallel>, #tpu.dimension_semantics<arbitrary>], iteration_bounds = array<i64: 1, 1>, scalar_prefetch = 0 : i64, scratch_operands = 1 : i64, tpu.core_type = #tpu.core_type<tc>, window_params = [{transform_indices = @transform_0, window_bounds = array<i64: 128, 128>}, {pipeline_mode = #tpu.pipeline_mode<synchronous>, transform_indices = @transform_1, window_bounds = array<i64: 128, 128>}, {pipeline_mode = #tpu.pipeline_mode<synchronous>, transform_indices = @transform_2, window_bounds = array<i64: 1, 128>}, {transform_indices = @transform_3, window_bounds = array<i64: 8, 128>}, {transform_indices = @transform_4, window_bounds = array<i64: 128, 128>}, {transform_indices = @transform_5, window_bounds = array<i64: 1, 8, 128>}]} {
    %c0_i32 = arith.constant 0 : i32
    %0 = arith.cmpi eq, %arg1, %c0_i32 : i32
    %1 = arith.extui %0 : i1 to i32
    %c0_i32_0 = arith.constant 0 : i32
    %2 = arith.cmpi ne, %1, %c0_i32_0 : i32
    scf.if %2 {
      %cst_9 = arith.constant 0.000000e+00 : f32
      %15 = vector.broadcast %cst_9 : f32 to vector<128x128xf32>
      %c0_10 = arith.constant 0 : index
      %c0_11 = arith.constant 0 : index
      %16 = vector.load %arg8[%c0_10, %c0_11] : memref<128x128xf32, #tpu.memory_space<vmem>>, vector<128x128xf32>
      tpu.vector_store %arg8[%c0_10, %c0_11], %15 {strides = array<i32>} : memref<128x128xf32, #tpu.memory_space<vmem>>, vector<128x128xf32>,
    } else {
    }
    %c128_i32 = arith.constant 128 : i32
    %3 = arith.muli %arg1, %c128_i32 : i32
    %4 = tpu.assume_multiple %3, 128 : i32
    %5 = arith.index_cast %4 : i32 to index
    %c0 = arith.constant 0 : index
    %6 = vector.load %arg3[%5, %c0] : memref<128x128xbf16, #tpu.memory_space<vmem>>, vector<128x128xbf16>
    %c0_1 = arith.constant 0 : index
    %c0_2 = arith.constant 0 : index
    %7 = vector.load %arg8[%c0_1, %c0_2] : memref<128x128xf32, #tpu.memory_space<vmem>>, vector<128x128xf32>
    %c0_3 = arith.constant 0 : index
    %c0_4 = arith.constant 0 : index
    %8 = vector.load %arg2[%c0_3, %c0_4] : memref<128x128xbf16, #tpu.memory_space<vmem>>, vector<128x128xbf16>
    %cst = arith.constant dense<0.000000e+00> : vector<128x128xf32>
    %9 = tpu.matmul %8, %6, %cst {dimension_numbers = #tpu.dot_dimension_numbers<[1], [0], [0], [1], [0, 0, 1, 1], [], []>} : vector<128x128xbf16>, vector<128x128xbf16>, vector<128x128xf32> -> vector<128x128xf32>
    %10 = arith.addf %7, %9 : vector<128x128xf32>
    %c0_5 = arith.constant 0 : index
    %c0_6 = arith.constant 0 : index
    %11 = vector.load %arg8[%c0_5, %c0_6] : memref<128x128xf32, #tpu.memory_space<vmem>>, vector<128x128xf32>
    tpu.vector_store %arg8[%c0_5, %c0_6], %10 {strides = array<i32>} : memref<128x128xf32, #tpu.memory_space<vmem>>, vector<128x128xf32>,
    %c0_i32_7 = arith.constant 0 : i32
    %12 = arith.cmpi eq, %arg1, %c0_i32_7 : i32
    %13 = arith.extui %12 : i1 to i32
    %c0_i32_8 = arith.constant 0 : i32
    %14 = arith.cmpi ne, %13, %c0_i32_8 : i32
    scf.if %14 {
      %c0_9 = arith.constant 0 : index
      %c0_10 = arith.constant 0 : index
      %15 = vector.load %arg8[%c0_9, %c0_10] : memref<128x128xf32, #tpu.memory_space<vmem>>, vector<128x128xf32>
      %c0_11 = arith.constant 0 : index
      %c0_12 = arith.constant 0 : index
      %16 = vector.load %arg4[%c0_11, %c0_12] : memref<1x128xf32, #tpu.memory_space<vmem>>, vector<1x128xf32>
      %17 = vector.broadcast %16 : vector<1x128xf32> to vector<128x128xf32>
      %18 = arith.addf %15, %17 : vector<128x128xf32>
      %cst_13 = arith.constant 0.000000e+00 : f32
      %19 = vector.broadcast %cst_13 : f32 to vector<128x128xf32>
      %20 = arith.maximumf %18, %19 : vector<128x128xf32>
      %21 = arith.truncf %20 : vector<128x128xf32> to vector<128x128xbf16>
      %c0_14 = arith.constant 0 : index
      %c0_15 = arith.constant 0 : index
      %22 = vector.load %arg6[%c0_14, %c0_15] : memref<128x128xbf16, #tpu.memory_space<vmem>>, vector<128x128xbf16>
      tpu.vector_store %arg6[%c0_14, %c0_15], %21 {strides = array<i32>} : memref<128x128xbf16, #tpu.memory_space<vmem>>, vector<128x128xbf16>,
      %c0_16 = arith.constant 0 : index
      %c0_17 = arith.constant 0 : index
      %23 = vector.load %arg5[%c0_16, %c0_17] : memref<8x128xbf16, #tpu.memory_space<vmem>>, vector<8x128xbf16>
      %cst_18 = arith.constant dense<0.000000e+00> : vector<8x128xf32>
      %24 = tpu.matmul %23, %21, %cst_18 {dimension_numbers = #tpu.dot_dimension_numbers<[1], [0], [0], [1], [0, 0, 1, 1], [], []>} : vector<8x128xbf16>, vector<128x128xbf16>, vector<8x128xf32> -> vector<8x128xf32>
      %c0_19 = arith.constant 0 : index
      %c0_20 = arith.constant 0 : index
      %c0_21 = arith.constant 0 : index
      %25 = vector.load %arg7[%c0_19, %c0_20, %c0_21] : memref<1x8x128xf32, #tpu.memory_space<vmem>>, vector<1x8x128xf32>
      %26 = vector.shape_cast %25 : vector<1x8x128xf32> to vector<8x128xf32>
      %27 = vector.shape_cast %24 : vector<8x128xf32> to vector<1x8x128xf32>
      tpu.vector_store %arg7[%c0_19, %c0_20, %c0_21], %27 {strides = array<i32>} : memref<1x8x128xf32, #tpu.memory_space<vmem>>, vector<1x8x128xf32>,
    } else {
    }
    return
  }
  func.func @transform_0(%arg0: i32, %arg1: i32) -> (i32, i32) {
    %c0_i32 = arith.constant 0 : i32
    return %arg0, %arg1 : i32, i32
  }
  func.func @transform_1(%arg0: i32, %arg1: i32) -> (i32, i32) {
    %c0_i32 = arith.constant 0 : i32
    %c0_i32_0 = arith.constant 0 : i32
    %c0_i32_1 = arith.constant 0 : i32
    return %c0_i32, %c0_i32_0 : i32, i32
  }
  func.func @transform_2(%arg0: i32, %arg1: i32) -> (i32, i32) {
    %c0_i32 = arith.constant 0 : i32
    %c0_i32_0 = arith.constant 0 : i32
    %c0_i32_1 = arith.constant 0 : i32
    return %c0_i32, %c0_i32_0 : i32, i32
  }
  func.func @transform_3(%arg0: i32, %arg1: i32) -> (i32, i32) {
    %c0_i32 = arith.constant 0 : i32
    %c0_i32_0 = arith.constant 0 : i32
    return %c0_i32, %arg0 : i32, i32
  }
  func.func @transform_4(%arg0: i32, %arg1: i32) -> (i32, i32) {
    %c0_i32 = arith.constant 0 : i32
    %c0_i32_0 = arith.constant 0 : i32
    return %arg0, %c0_i32 : i32, i32
  }
  func.func @transform_5(%arg0: i32, %arg1: i32) -> (i32, i32, i32) {
    %c0_i32 = arith.constant 0 : i32
    %c0_i32_0 = arith.constant 0 : i32
    %c0_i32_1 = arith.constant 0 : i32
    return %arg0, %c0_i32, %c0_i32_0 : i32, i32, i32
  }
}

module attributes {stable_mosaic.version = 11 : i64} {
  func.func @_project_kernel(%arg0: i32, %arg1: memref<128x128xbf16, #tpu.memory_space<vmem>>, %arg2: memref<128x128xbf16, #tpu.memory_space<vmem>>, %arg3: memref<128x128xbf16, #tpu.memory_space<vmem>>) attributes {dimension_semantics = [#tpu.dimension_semantics<parallel>], iteration_bounds = array<i64: 1>, scalar_prefetch = 0 : i64, scratch_operands = 0 : i64, tpu.core_type = #tpu.core_type<tc>, window_params = [{transform_indices = @transform_0, window_bounds = array<i64: 128, 128>}, {pipeline_mode = #tpu.pipeline_mode<synchronous>, transform_indices = @transform_1, window_bounds = array<i64: 128, 128>}, {transform_indices = @transform_2, window_bounds = array<i64: 128, 128>}]} {
    %c0 = arith.constant 0 : index
    %c0_0 = arith.constant 0 : index
    %0 = vector.load %arg1[%c0, %c0_0] : memref<128x128xbf16, #tpu.memory_space<vmem>>, vector<128x128xbf16>
    %c0_1 = arith.constant 0 : index
    %c0_2 = arith.constant 0 : index
    %1 = vector.load %arg2[%c0_1, %c0_2] : memref<128x128xbf16, #tpu.memory_space<vmem>>, vector<128x128xbf16>
    %cst = arith.constant dense<0.000000e+00> : vector<128x128xf32>
    %2 = tpu.matmul %0, %1, %cst {dimension_numbers = #tpu.dot_dimension_numbers<[1], [0], [0], [1], [0, 0, 1, 1], [], []>} : vector<128x128xbf16>, vector<128x128xbf16>, vector<128x128xf32> -> vector<128x128xf32>
    %3 = arith.truncf %2 : vector<128x128xf32> to vector<128x128xbf16>
    %c0_3 = arith.constant 0 : index
    %c0_4 = arith.constant 0 : index
    %4 = vector.load %arg3[%c0_3, %c0_4] : memref<128x128xbf16, #tpu.memory_space<vmem>>, vector<128x128xbf16>
    tpu.vector_store %arg3[%c0_3, %c0_4], %3 {strides = array<i32>} : memref<128x128xbf16, #tpu.memory_space<vmem>>, vector<128x128xbf16>,
    return
  }
  func.func @transform_0(%arg0: i32) -> (i32, i32) {
    %c0_i32 = arith.constant 0 : i32
    %c0_i32_0 = arith.constant 0 : i32
    return %arg0, %c0_i32 : i32, i32
  }
  func.func @transform_1(%arg0: i32) -> (i32, i32) {
    %c0_i32 = arith.constant 0 : i32
    %c0_i32_0 = arith.constant 0 : i32
    %c0_i32_1 = arith.constant 0 : i32
    return %c0_i32, %c0_i32_0 : i32, i32
  }
  func.func @transform_2(%arg0: i32) -> (i32, i32) {
    %c0_i32 = arith.constant 0 : i32
    %c0_i32_0 = arith.constant 0 : i32
    return %arg0, %c0_i32 : i32, i32
  }
}

module attributes {stable_mosaic.version = 11 : i64} {
  func.func @_gcn_layer_kernel(%arg0: i32, %arg1: i32, %arg2: memref<128x128xbf16, #tpu.memory_space<vmem>>, %arg3: memref<128x128xbf16, #tpu.memory_space<vmem>>, %arg4: memref<128x128xbf16, #tpu.memory_space<vmem>>, %arg5: memref<1x128xf32, #tpu.memory_space<vmem>>, %arg6: memref<8x128xbf16, #tpu.memory_space<vmem>>, %arg7: memref<128x128xbf16, #tpu.memory_space<vmem>>, %arg8: memref<1x8x128xf32, #tpu.memory_space<vmem>>, %arg9: memref<128x128xf32, #tpu.memory_space<vmem>>) attributes {dimension_semantics = [#tpu.dimension_semantics<parallel>, #tpu.dimension_semantics<arbitrary>], iteration_bounds = array<i64: 1, 1>, scalar_prefetch = 0 : i64, scratch_operands = 1 : i64, tpu.core_type = #tpu.core_type<tc>, window_params = [{transform_indices = @transform_0, window_bounds = array<i64: 128, 128>}, {pipeline_mode = #tpu.pipeline_mode<synchronous>, transform_indices = @transform_1, window_bounds = array<i64: 128, 128>}, {pipeline_mode = #tpu.pipeline_mode<synchronous>, transform_indices = @transform_2, window_bounds = array<i64: 128, 128>}, {pipeline_mode = #tpu.pipeline_mode<synchronous>, transform_indices = @transform_3, window_bounds = array<i64: 1, 128>}, {transform_indices = @transform_4, window_bounds = array<i64: 8, 128>}, {transform_indices = @transform_5, window_bounds = array<i64: 128, 128>}, {transform_indices = @transform_6, window_bounds = array<i64: 1, 8, 128>}]} {
    %c0_i32 = arith.constant 0 : i32
    %0 = arith.cmpi eq, %arg1, %c0_i32 : i32
    %1 = arith.extui %0 : i1 to i32
    %c0_i32_0 = arith.constant 0 : i32
    %2 = arith.cmpi ne, %1, %c0_i32_0 : i32
    scf.if %2 {
      %cst_9 = arith.constant 0.000000e+00 : f32
      %15 = vector.broadcast %cst_9 : f32 to vector<128x128xf32>
      %c0_10 = arith.constant 0 : index
      %c0_11 = arith.constant 0 : index
      %16 = vector.load %arg9[%c0_10, %c0_11] : memref<128x128xf32, #tpu.memory_space<vmem>>, vector<128x128xf32>
      tpu.vector_store %arg9[%c0_10, %c0_11], %15 {strides = array<i32>} : memref<128x128xf32, #tpu.memory_space<vmem>>, vector<128x128xf32>,
    } else {
    }
    %c128_i32 = arith.constant 128 : i32
    %3 = arith.muli %arg1, %c128_i32 : i32
    %4 = tpu.assume_multiple %3, 128 : i32
    %5 = arith.index_cast %4 : i32 to index
    %c0 = arith.constant 0 : index
    %6 = vector.load %arg3[%5, %c0] : memref<128x128xbf16, #tpu.memory_space<vmem>>, vector<128x128xbf16>
    %c0_1 = arith.constant 0 : index
    %c0_2 = arith.constant 0 : index
    %7 = vector.load %arg9[%c0_1, %c0_2] : memref<128x128xf32, #tpu.memory_space<vmem>>, vector<128x128xf32>
    %c0_3 = arith.constant 0 : index
    %c0_4 = arith.constant 0 : index
    %8 = vector.load %arg2[%c0_3, %c0_4] : memref<128x128xbf16, #tpu.memory_space<vmem>>, vector<128x128xbf16>
    %cst = arith.constant dense<0.000000e+00> : vector<128x128xf32>
    %9 = tpu.matmul %8, %6, %cst {dimension_numbers = #tpu.dot_dimension_numbers<[1], [0], [0], [1], [0, 0, 1, 1], [], []>} : vector<128x128xbf16>, vector<128x128xbf16>, vector<128x128xf32> -> vector<128x128xf32>
    %10 = arith.addf %7, %9 : vector<128x128xf32>
    %c0_5 = arith.constant 0 : index
    %c0_6 = arith.constant 0 : index
    %11 = vector.load %arg9[%c0_5, %c0_6] : memref<128x128xf32, #tpu.memory_space<vmem>>, vector<128x128xf32>
    tpu.vector_store %arg9[%c0_5, %c0_6], %10 {strides = array<i32>} : memref<128x128xf32, #tpu.memory_space<vmem>>, vector<128x128xf32>,
    %c0_i32_7 = arith.constant 0 : i32
    %12 = arith.cmpi eq, %arg1, %c0_i32_7 : i32
    %13 = arith.extui %12 : i1 to i32
    %c0_i32_8 = arith.constant 0 : i32
    %14 = arith.cmpi ne, %13, %c0_i32_8 : i32
    scf.if %14 {
      %c0_9 = arith.constant 0 : index
      %c0_10 = arith.constant 0 : index
      %15 = vector.load %arg9[%c0_9, %c0_10] : memref<128x128xf32, #tpu.memory_space<vmem>>, vector<128x128xf32>
      %16 = arith.truncf %15 : vector<128x128xf32> to vector<128x128xbf16>
      %c0_11 = arith.constant 0 : index
      %c0_12 = arith.constant 0 : index
      %17 = vector.load %arg4[%c0_11, %c0_12] : memref<128x128xbf16, #tpu.memory_space<vmem>>, vector<128x128xbf16>
      %cst_13 = arith.constant dense<0.000000e+00> : vector<128x128xf32>
      %18 = tpu.matmul %16, %17, %cst_13 {dimension_numbers = #tpu.dot_dimension_numbers<[1], [0], [0], [1], [0, 0, 1, 1], [], []>} : vector<128x128xbf16>, vector<128x128xbf16>, vector<128x128xf32> -> vector<128x128xf32>
      %c0_14 = arith.constant 0 : index
      %c0_15 = arith.constant 0 : index
      %19 = vector.load %arg5[%c0_14, %c0_15] : memref<1x128xf32, #tpu.memory_space<vmem>>, vector<1x128xf32>
      %20 = vector.broadcast %19 : vector<1x128xf32> to vector<128x128xf32>
      %21 = arith.addf %18, %20 : vector<128x128xf32>
      %cst_16 = arith.constant 0.000000e+00 : f32
      %22 = vector.broadcast %cst_16 : f32 to vector<128x128xf32>
      %23 = arith.maximumf %21, %22 : vector<128x128xf32>
      %24 = arith.truncf %23 : vector<128x128xf32> to vector<128x128xbf16>
      %c0_17 = arith.constant 0 : index
      %c0_18 = arith.constant 0 : index
      %25 = vector.load %arg7[%c0_17, %c0_18] : memref<128x128xbf16, #tpu.memory_space<vmem>>, vector<128x128xbf16>
      tpu.vector_store %arg7[%c0_17, %c0_18], %24 {strides = array<i32>} : memref<128x128xbf16, #tpu.memory_space<vmem>>, vector<128x128xbf16>,
      %c0_19 = arith.constant 0 : index
      %c0_20 = arith.constant 0 : index
      %26 = vector.load %arg6[%c0_19, %c0_20] : memref<8x128xbf16, #tpu.memory_space<vmem>>, vector<8x128xbf16>
      %cst_21 = arith.constant dense<0.000000e+00> : vector<8x128xf32>
      %27 = tpu.matmul %26, %24, %cst_21 {dimension_numbers = #tpu.dot_dimension_numbers<[1], [0], [0], [1], [0, 0, 1, 1], [], []>} : vector<8x128xbf16>, vector<128x128xbf16>, vector<8x128xf32> -> vector<8x128xf32>
      %c0_22 = arith.constant 0 : index
      %c0_23 = arith.constant 0 : index
      %c0_24 = arith.constant 0 : index
      %28 = vector.load %arg8[%c0_22, %c0_23, %c0_24] : memref<1x8x128xf32, #tpu.memory_space<vmem>>, vector<1x8x128xf32>
      %29 = vector.shape_cast %28 : vector<1x8x128xf32> to vector<8x128xf32>
      %30 = vector.shape_cast %27 : vector<8x128xf32> to vector<1x8x128xf32>
      tpu.vector_store %arg8[%c0_22, %c0_23, %c0_24], %30 {strides = array<i32>} : memref<1x8x128xf32, #tpu.memory_space<vmem>>, vector<1x8x128xf32>,
    } else {
    }
    return
  }
  func.func @transform_0(%arg0: i32, %arg1: i32) -> (i32, i32) {
    %c0_i32 = arith.constant 0 : i32
    return %arg0, %arg1 : i32, i32
  }
  func.func @transform_1(%arg0: i32, %arg1: i32) -> (i32, i32) {
    %c0_i32 = arith.constant 0 : i32
    %c0_i32_0 = arith.constant 0 : i32
    %c0_i32_1 = arith.constant 0 : i32
    return %c0_i32, %c0_i32_0 : i32, i32
  }
  func.func @transform_2(%arg0: i32, %arg1: i32) -> (i32, i32) {
    %c0_i32 = arith.constant 0 : i32
    %c0_i32_0 = arith.constant 0 : i32
    %c0_i32_1 = arith.constant 0 : i32
    return %c0_i32, %c0_i32_0 : i32, i32
  }
  func.func @transform_3(%arg0: i32, %arg1: i32) -> (i32, i32) {
    %c0_i32 = arith.constant 0 : i32
    %c0_i32_0 = arith.constant 0 : i32
    %c0_i32_1 = arith.constant 0 : i32
    return %c0_i32, %c0_i32_0 : i32, i32
  }
  func.func @transform_4(%arg0: i32, %arg1: i32) -> (i32, i32) {
    %c0_i32 = arith.constant 0 : i32
    %c0_i32_0 = arith.constant 0 : i32
    return %c0_i32, %arg0 : i32, i32
  }
  func.func @transform_5(%arg0: i32, %arg1: i32) -> (i32, i32) {
    %c0_i32 = arith.constant 0 : i32
    %c0_i32_0 = arith.constant 0 : i32
    return %arg0, %c0_i32 : i32, i32
  }
  func.func @transform_6(%arg0: i32, %arg1: i32) -> (i32, i32, i32) {
    %c0_i32 = arith.constant 0 : i32
    %c0_i32_0 = arith.constant 0 : i32
    %c0_i32_1 = arith.constant 0 : i32
    return %arg0, %c0_i32, %c0_i32_0 : i32, i32, i32
  }
}

</mosaic_0001>

<bundles_post_ra>
// kernel: gcn_block_forward.4
= control target key start
LH: loop header
LB: loop body
LE: loop exit
PB: predicated region body
PF: predicated region fallthrough
CT: control target
= control target key end

     0   :  { %s583_s1 = inlined_call_operand.vmem [shape: bf16[128,128], index: 1, kind: input, shape index: {}]   ;;  %s584_s0 = inlined_call_operand.vmem [shape: bf16[128,128], index: 0, kind: input, shape index: {}]   ;;  %s585_s2 = inlined_call_operand.vmem [shape: bf16[128,128], index: 2, kind: output, shape index: {}]  }
   0x1   :  { %v480_v0 = vld [vmem:[%s583_s1] sm:$0xff]   ;;  %v481_v1 = vld [vmem:[%s583_s1 + $0x8] sm:$0xff]   ;;  %v482_v2 = vld [vmem:[%s583_s1 + $0x10] sm:$0xff]  }
   0x2   :  { %432 = vmatprep.subr.bf16.mxu0 %v480_v0  ;;  %464 = vmatprep.subr.bf16.mxu1 %v480_v0  ;;  %v483_v3 = vld [vmem:[%s583_s1 + $0x18] sm:$0xff]   ;;  %v488_v4 = vld [vmem:[%s584_s0] sm:$0xff]   ;;  %v485_v7 = vld [vmem:[%s583_s1 + $0x28] sm:$0xff]  }
   0x3   :  { %433 = vmatpush3.bf16.msra.mxu0 %v480_v0  ;;  %472 = vmatpush3.bf16.msra.mxu1 %v480_v0  ;;  %v489_v5 = vld [vmem:[%s584_s0 + $0x20] sm:$0xff]   ;;  %v486_v8 = vld [vmem:[%s583_s1 + $0x30] sm:$0xff]   ;;  %v487_v9 = vld [vmem:[%s583_s1 + $0x38] sm:$0xff]  }
   0x4   :  { %434 = vmatprep.subr.bf16.mxu0 %v481_v1  ;;  %465 = vmatprep.subr.bf16.mxu1 %v481_v1  ;;  %v484_v6 = vld [vmem:[%s583_s1 + $0x20] sm:$0xff]   ;;  %v490_v10 = vld [vmem:[%s584_s0 + $0x8] sm:$0xff]   ;;  %v492_v12 = vld [vmem:[%s584_s0 + $0x10] sm:$0xff]  }
   0x5   :  { %448 = vmatprep.mubr.bf16.mxu0 %v488_v4  ;;  %456 = vmatprep.mubr.bf16.mxu1 %v489_v5  ;;  %v491_v11 = vld [vmem:[%s584_s0 + $0x28] sm:$0xff]   ;;  %v493_v13 = vld [vmem:[%s584_s0 + $0x30] sm:$0xff]   ;;  %v494_v14 = vld [vmem:[%s584_s0 + $0x18] sm:$0xff]  }
   0x6   :  { %v495_v15 = vld [vmem:[%s584_s0 + $0x38] sm:$0xff]  }
   0x7   :  { %435 = vmatpush3.bf16.msra.mxu0 %v481_v1  ;;  %473 = vmatpush3.bf16.msra.mxu1 %v481_v1 }
   0x8   :  { %436 = vmatprep.subr.bf16.mxu0 %v482_v2  ;;  %466 = vmatprep.subr.bf16.mxu1 %v482_v2 }
   0xb   :  { %437 = vmatpush3.bf16.msra.mxu0 %v482_v2  ;;  %474 = vmatpush3.bf16.msra.mxu1 %v482_v2 }
   0xc   :  { %438 = vmatprep.subr.bf16.mxu0 %v483_v3  ;;  %467 = vmatprep.subr.bf16.mxu1 %v483_v3 }
   0xf   :  { %439 = vmatpush3.bf16.msra.mxu0 %v483_v3  ;;  %475 = vmatpush3.bf16.msra.mxu1 %v483_v3 }
  0x10   :  { %440 = vmatprep.subr.bf16.mxu0 %v484_v6  ;;  %468 = vmatprep.subr.bf16.mxu1 %v484_v6 }
  0x13   :  { %441 = vmatpush3.bf16.msra.mxu0 %v484_v6  ;;  %476 = vmatpush3.bf16.msra.mxu1 %v484_v6 }
  0x14   :  { %442 = vmatprep.subr.bf16.mxu0 %v485_v7  ;;  %469 = vmatprep.subr.bf16.mxu1 %v485_v7 }
  0x17   :  { %443 = vmatpush3.bf16.msra.mxu0 %v485_v7  ;;  %477 = vmatpush3.bf16.msra.mxu1 %v485_v7 }
  0x18   :  { %444 = vmatprep.subr.bf16.mxu0 %v486_v8  ;;  %470 = vmatprep.subr.bf16.mxu1 %v486_v8 }
  0x1b   :  { %445 = vmatpush3.bf16.msra.mxu0 %v486_v8  ;;  %478 = vmatpush3.bf16.msra.mxu1 %v486_v8 }
  0x1c   :  { %446 = vmatprep.subr.bf16.mxu0 %v487_v9  ;;  %471 = vmatprep.subr.bf16.mxu1 %v487_v9 }
  0x1f   :  { %447 = vmatpush3.bf16.msra.mxu0 %v487_v9  ;;  %479 = vmatpush3.bf16.msra.mxu1 %v487_v9 }
  0x22   :  { %449 = vmatmul.mubr.bf16.vlgmr.msra.gmra.mrb[0].mxu0 %v490_v10  ;;  %457 = vmatmul.mubr.bf16.vlgmr.msra.gmra.mrb[0].mxu1 %v491_v11 }
  0x23   :  { %452 = vmatprep.mubr.bf16.mxu0 %v492_v12  ;;  %460 = vmatprep.mubr.bf16.mxu1 %v493_v13 }
  0x2a   :  { %453 = vmatmul.mubr.bf16.gmra.mrb[4].mxu0 %v494_v14  ;;  %461 = vmatmul.mubr.bf16.gmra.mrb[4].mxu1 %v495_v15 }
  0xf5   :  { %v450_v16 = vpop.f32.mrb[0].mxu0  ;;  %v458_v17 = vpop.f32.mrb[0].mxu1 }
  0xf6   :  { %v174_v18 = vpop.f32.mrb[1].mxu0  ;;  %v206_v19 = vpop.f32.mrb[1].mxu1 }
  0xf7   :  { %v451_v20 = vpop.f32.mrb[2].mxu0  ;;  %v459_v21 = vpop.f32.mrb[2].mxu1 }
  0xf8   :  { %v377_v22 = vpack.c.bf16 %v451_v20, %v450_v16  ;;  %v397_v23 = vpack.c.bf16 %v459_v21, %v458_v17  ;;  %v177_v24 = vpop.f32.mrb[3].mxu0  ;;  %v209_v25 = vpop.f32.mrb[3].mxu1 }
  0xf9   :  { %v372_v26 = vpack.c.bf16 %v177_v24, %v174_v18  ;;  %v392_v27 = vpack.c.bf16 %v209_v25, %v206_v19 }
  0xfa   :  { %409 = vst [vmem:[%s585_s2 + $0x8] sm:$0xff] %v377_v22   ;;  %413 = vst [vmem:[%s585_s2 + $0x28] sm:$0xff] %v397_v23  }
  0xfb   :  { %373 = vst [vmem:[%s585_s2] sm:$0xff] %v372_v26   ;;  %412 = vst [vmem:[%s585_s2 + $0x20] sm:$0xff] %v392_v27  }
  0xfd   :  { %v454_v28 = vpop.f32.mrb[4].mxu0  ;;  %v462_v29 = vpop.f32.mrb[4].mxu1 }
  0xfe   :  { %v190_v30 = vpop.f32.mrb[5].mxu0  ;;  %v222_v31 = vpop.f32.mrb[5].mxu1 }
  0xff   :  { %v455_v32 = vpop.f32.mrb[6].mxu0  ;;  %v463_v33 = vpop.f32.mrb[6].mxu1 }
 0x100   :  { %v387_v34 = vpack.c.bf16 %v455_v32, %v454_v28  ;;  %v407_v35 = vpack.c.bf16 %v463_v33, %v462_v29  ;;  %v193_v36 = vpop.f32.mrb[7].mxu0  ;;  %v225_v37 = vpop.f32.mrb[7].mxu1 }
 0x101   :  { %v382_v38 = vpack.c.bf16 %v193_v36, %v190_v30  ;;  %v402_v39 = vpack.c.bf16 %v225_v37, %v222_v31 }
 0x102   :  { %411 = vst [vmem:[%s585_s2 + $0x18] sm:$0xff] %v387_v34   ;;  %415 = vst [vmem:[%s585_s2 + $0x38] sm:$0xff] %v407_v35  }
 0x103   :  { %410 = vst [vmem:[%s585_s2 + $0x10] sm:$0xff] %v382_v38   ;;  %414 = vst [vmem:[%s585_s2 + $0x30] sm:$0xff] %v402_v39  }

// kernel: gcn_block_forward.5
= control target key start
LH: loop header
LB: loop body
LE: loop exit
PB: predicated region body
PF: predicated region fallthrough
CT: control target
= control target key end

     0   :  { %s870_s0 = inlined_call_operand.vmem [shape: bf16[128,128], index: 0, kind: input, shape index: {}]   ;;  %s871_s1 = inlined_call_operand.vmem [shape: bf16[128,128], index: 1, kind: input, shape index: {}]   ;;  %s872_s2 = inlined_call_operand.vmem [shape: f32[1,128], index: 2, kind: input, shape index: {}]   ;;  %s873_s3 = inlined_call_operand.vmem [shape: bf16[8,128], index: 3, kind: input, shape index: {}]   ;;  %s874_s4 = inlined_call_operand.hbm [shape: bf16[128,128], index: 4, kind: output, shape index: {0}]   ;;  %s875_s5 = inlined_call_operand.vmem [shape: f32[1,8,128], index: 5, kind: output, shape index: {1}]  }
   0x1   :  { %v699_v0 = vld [vmem:[%s871_s1] sm:$0xff]   ;;  %v700_v1 = vld [vmem:[%s871_s1 + $0x8] sm:$0xff]   ;;  %v701_v2 = vld [vmem:[%s871_s1 + $0x10] sm:$0xff]  }
   0x2   :  { %642 = vmatprep.subr.bf16.mxu0 %v699_v0  ;;  %v702_v3 = vld [vmem:[%s871_s1 + $0x18] sm:$0xff]   ;;  %v707_v4 = vld [vmem:[%s870_s0] sm:$0xff]   ;;  %v704_v6 = vld [vmem:[%s871_s1 + $0x28] sm:$0xff]  }
   0x3   :  { %643 = vmatpush3.bf16.msra.mxu0 %v699_v0  ;;  %658 = vmatprep.mubr.bf16.mxu0 %v707_v4  ;;  %v703_v5 = vld [vmem:[%s871_s1 + $0x20] sm:$0xff]  }
   0x4   :  { %644 = vmatprep.subr.bf16.mxu0 %v700_v1 }
   0x7   :  { %645 = vmatpush3.bf16.msra.mxu0 %v700_v1 }
   0x8   :  { %646 = vmatprep.subr.bf16.mxu0 %v701_v2 }
   0xb   :  { %647 = vmatpush3.bf16.msra.mxu0 %v701_v2 }
   0xc   :  { %648 = vmatprep.subr.bf16.mxu0 %v702_v3 }
   0xf   :  { %649 = vmatpush3.bf16.msra.mxu0 %v702_v3 }
  0x10   :  { %650 = vmatprep.subr.bf16.mxu0 %v703_v5 }
  0x11   :  { %11 = vsyncpa [#allocation4], 0  ;;  %v705_v7 = vld [vmem:[%s871_s1 + $0x30] sm:$0xff]   ;;  %v706_v8 = vld [vmem:[%s871_s1 + $0x38] sm:$0xff]   ;;  %v739_v16 = vmov 0.0   ;;  %vm740_vm0 = vmmov 0  }
  0x12   :  { %v708_v9 = vld [vmem:[%s870_s0 + $0x8] sm:$0xff]   ;;  %v709_v10 = vld [vmem:[%s870_s0 + $0x10] sm:$0xff]   ;;  %v710_v11 = vld [vmem:[%s870_s0 + $0x18] sm:$0xff]   ;;  %674 = vmatprep.subr.bf16.mxu1 %v739_v16  ;;  %690 = vmatprep.mubr.msk.bf16.mxu1 %vm740_vm0, %v739_v16  ;;  %s741_s26 = smov [#allocation3]  }
  0x13   :  { %651 = vmatpush3.bf16.msra.mxu0 %v703_v5  ;;  %v711_v12 = vld [vmem:[%s870_s0 + $0x20] sm:$0xff]   ;;  %v712_v13 = vld [vmem:[%s870_s0 + $0x28] sm:$0xff]   ;;  %v713_v14 = vld [vmem:[%s870_s0 + $0x30] sm:$0xff]   ;;  %s504_s27 = sshll.u32 %s741_s26, 4  ;;  %s505_s27 = int_to_ptr.vmem [resolvable:$true] %s504_s27 }
  0x14   :  { %652 = vmatprep.subr.bf16.mxu0 %v704_v6  ;;  %v714_v15 = vld [vmem:[%s870_s0 + $0x38] sm:$0xff]   ;;  %v827_v17 = vld [vmem:[%s872_s2] ss:$0 sm:$0xff]  ;;  %s715_s28 = scalar_lea.vmem %s505_s27, 1024  ;;  %p720_p1 = scmp.lt.s32.totalorder %s505_s27, %s505_s27 }
  0x15   :  { %p716_p0 = scmp.ne.s32.totalorder %s505_s27, %s715_s28  ;;  %p721_p2 = scmp.lt.s32.totalorder %s715_s28, %s715_s28 }
  0x17   :  { %653 = vmatpush3.bf16.msra.mxu0 %v704_v6  ;;  %p722_p3 = por %p721_p2, %p720_p1 }
  0x18   :  { %654 = vmatprep.subr.bf16.mxu0 %v705_v7 }
  0x19   :  { %p723_p4 = pnand %p722_p3, %p716_p0 }
  0x1b   :  { %655 = vmatpush3.bf16.msra.mxu0 %v705_v7 }
  0x1c   :  { %656 = vmatprep.subr.bf16.mxu0 %v706_v8 }
  0x1f   :  { %657 = vmatpush3.bf16.msra.mxu0 %v706_v8 }
  0x22   :  { %659 = vmatmul.mubr.bf16.vlgmr.msra.gmra.mrb[0].mxu0 %v708_v9 }
  0x23   :  { %662 = vmatprep.mubr.bf16.mxu0 %v709_v10  ;;  %v457_v10 = vld [vmem:[%s873_s3] sm:$0xf] }
  0x2a   :  { %663 = vmatmul.mubr.bf16.gmra.mrb[4].mxu0 %v710_v11 }
  0x2b   :  { %666 = vmatprep.mubr.bf16.mxu0 %v711_v12 }
  0x32   :  { %667 = vmatmul.mubr.bf16.gmra.mrb[8].mxu0 %v712_v13 }
  0x33   :  { %670 = vmatprep.mubr.bf16.mxu0 %v713_v14 }
  0x3a   :  { %671 = vmatmul.mubr.bf16.gmra.mrb[12].mxu0 %v714_v15 }
  0xf5   :  { %v660_v18 = vpop.f32.mrb[0].mxu0 }
  0xf6   :  { %v347_v19 = vadd.f32 %v660_v18, %v827_v17  ;;  %v224_v20 = vpop.f32.mrb[1].mxu0 }
  0xf7   :  { %v345_v21 = vadd.f32 %v827_v17, %v224_v20  ;;  %v661_v22 = vpop.f32.mrb[2].mxu0 }
  0xf8   :  { %v348_v23 = vadd.f32 %v661_v22, %v827_v17  ;;  %v227_v24 = vpop.f32.mrb[3].mxu0  ;;  %v363_v26 = vmax.f32 %v347_v19, 0.0 }
  0xf9   :  { %v346_v25 = vadd.f32 %v827_v17, %v227_v24  ;;  %v361_v28 = vmax.f32 %v345_v21, 0.0 }
  0xfa   :  { %v364_v27 = vmax.f32 %v348_v23, 0.0 }
  0xfb   :  { %v362_v29 = vmax.f32 %v346_v25, 0.0 }
  0xfc   :  { %v378_v30 = vpack.c.bf16 %v364_v27, %v363_v26 }
  0xfd   :  { %v664_v31 = vpop.f32.mrb[4].mxu0  ;;  %v377_v32 = vpack.c.bf16 %v362_v29, %v361_v28 }
  0xfe   :  { %610 = vst [vmem:[#allocation3 + $0x8] sm:$0xff] %v378_v30   ;;  %v351_v33 = vadd.f32 %v664_v31, %v827_v17  ;;  %v240_v34 = vpop.f32.mrb[5].mxu0 }
  0xff   :  { %v349_v35 = vadd.f32 %v827_v17, %v240_v34  ;;  %v665_v36 = vpop.f32.mrb[6].mxu0  ;;  %574 = vst [vmem:[#allocation3] sm:$0xff] %v377_v32   ;;  %675 = vmatpush3.bf16.msra.mxu1 %v377_v32 }
 0x100   :  { %v352_v37 = vadd.f32 %v665_v36, %v827_v17  ;;  %v243_v38 = vpop.f32.mrb[7].mxu0  ;;  %676 = vmatprep.subr.bf16.mxu1 %v739_v16  ;;  %v367_v40 = vmax.f32 %v351_v33, 0.0 }
 0x101   :  { %v350_v39 = vadd.f32 %v827_v17, %v243_v38  ;;  %v365_v42 = vmax.f32 %v349_v35, 0.0 }
 0x102   :  { %v368_v41 = vmax.f32 %v352_v37, 0.0 }
 0x103   :  { %v366_v43 = vmax.f32 %v350_v39, 0.0  ;;  %677 = vmatpush3.bf16.msra.mxu1 %v378_v30 }
 0x104   :  { %v380_v44 = vpack.c.bf16 %v368_v41, %v367_v40  ;;  %678 = vmatprep.subr.bf16.mxu1 %v739_v16 }
 0x105   :  { %v379_v45 = vpack.c.bf16 %v366_v43, %v365_v42  ;;  %v668_v46 = vpop.f32.mrb[8].mxu0 }
 0x106   :  { %612 = vst [vmem:[#allocation3 + $0x18] sm:$0xff] %v380_v44   ;;  %v355_v47 = vadd.f32 %v668_v46, %v827_v17  ;;  %v256_v48 = vpop.f32.mrb[9].mxu0 }
 0x107   :  { %611 = vst [vmem:[#allocation3 + $0x10] sm:$0xff] %v379_v45   ;;  %v353_v49 = vadd.f32 %v827_v17, %v256_v48  ;;  %v669_v50 = vpop.f32.mrb[10].mxu0  ;;  %679 = vmatpush3.bf16.msra.mxu1 %v379_v45 }
 0x108   :  { %v356_v51 = vadd.f32 %v669_v50, %v827_v17  ;;  %v259_v52 = vpop.f32.mrb[11].mxu0  ;;  %680 = vmatprep.subr.bf16.mxu1 %v739_v16  ;;  %v371_v54 = vmax.f32 %v355_v47, 0.0 }
 0x109   :  { %v354_v53 = vadd.f32 %v827_v17, %v259_v52  ;;  %v369_v56 = vmax.f32 %v353_v49, 0.0 }
 0x10a   :  { %v372_v55 = vmax.f32 %v356_v51, 0.0 }
 0x10b   :  { %v370_v57 = vmax.f32 %v354_v53, 0.0  ;;  %681 = vmatpush3.bf16.msra.mxu1 %v380_v44 }
 0x10c   :  { %v382_v58 = vpack.c.bf16 %v372_v55, %v371_v54  ;;  %682 = vmatprep.subr.bf16.mxu1 %v739_v16 }
 0x10d   :  { %v381_v59 = vpack.c.bf16 %v370_v57, %v369_v56  ;;  %v672_v60 = vpop.f32.mrb[12].mxu0 }
 0x10e   :  { %614 = vst [vmem:[#allocation3 + $0x28] sm:$0xff] %v382_v58   ;;  %v359_v61 = vadd.f32 %v672_v60, %v827_v17  ;;  %v272_v62 = vpop.f32.mrb[13].mxu0 }
 0x10f   :  { %613 = vst [vmem:[#allocation3 + $0x20] sm:$0xff] %v381_v59   ;;  %v357_v63 = vadd.f32 %v827_v17, %v272_v62  ;;  %v673_v0 = vpop.f32.mrb[14].mxu0  ;;  %683 = vmatpush3.bf16.msra.mxu1 %v381_v59 }
 0x110   :  { %v360_v1 = vadd.f32 %v673_v0, %v827_v17  ;;  %v275_v2 = vpop.f32.mrb[15].mxu0  ;;  %684 = vmatprep.subr.bf16.mxu1 %v739_v16  ;;  %v375_v4 = vmax.f32 %v359_v61, 0.0 }
 0x111   :  { %v358_v3 = vadd.f32 %v827_v17, %v275_v2  ;;  %v373_v6 = vmax.f32 %v357_v63, 0.0 }
 0x112   :  { %v376_v5 = vmax.f32 %v360_v1, 0.0 }
 0x113   :  { %v374_v7 = vmax.f32 %v358_v3, 0.0  ;;  %685 = vmatpush3.bf16.msra.mxu1 %v382_v58 }
 0x114   :  { %v384_v8 = vpack.c.bf16 %v376_v5, %v375_v4  ;;  %686 = vmatprep.subr.bf16.mxu1 %v739_v16 }
 0x115   :  { %v383_v9 = vpack.c.bf16 %v374_v7, %v373_v6 }
 0x116   :  { %616 = vst [vmem:[#allocation3 + $0x38] sm:$0xff] %v384_v8  }
 0x117   :  { %615 = vst [vmem:[#allocation3 + $0x30] sm:$0xff] %v383_v9   ;;  %687 = vmatpush3.bf16.msra.mxu1 %v383_v9 }
 0x118   :  { %688 = vmatprep.subr.bf16.mxu1 %v739_v16 }
 0x11b   :  { %689 = vmatpush3.bf16.msra.mxu1 %v384_v8 }
 0x11e   :  { %691 = vmatmul.mubr.bf16.vlgmr.msra.gmra.mrb[0].mxu1 %v457_v10 }
 0x11f   :  { %726 = shalt.err (!%p723_p4)
}
 0x120   :  { %s727_s6 = scalar_lea.hbm %s874_s4, 1024 }
 0x121   :  { %p728_p5 = scmp.ne.s32.totalorder %s874_s4, %s727_s6  ;;  %p731_p6 = scmp.lt.u32.totalorder %s727_s6, %s874_s4 }
 0x123   :  { %p733_p7 = pnand %p731_p6, %p728_p5 }
 0x125   :  { %736 = shalt.err (!%p733_p7)
}
 0x126   :  { %s742_s10 = smov 64   ;;  %s743_s11 = smov 4  }
 0x127   :  { %510 = dma.vmem_to_hbm [thread:$0]  %s505_s27, 1024, %s874_s4, [#allocation4], %s742_s10, %s742_s10, %s743_s11  }
 0x1f1   :  { %v492_v11 = vpop.f32.mrb[0].mxu1 }
 0x1f2   :  { %498 = vst [vmem:[%s875_s5] sm:$0xff] %v492_v11  ;;  %v692_v12 = vpop.f32.mrb[1].mxu1 }
 0x1f3   :  { %v495_v13 = vpop.f32.mrb[2].mxu1 }
 0x1f4   :  { %v693_v14 = vpop.f32.mrb[3].mxu1 }
 0x1f5   :  { %737 = dma.done.wait [#allocation4], 1024  }
 0x1f6   :  { %738 = vsyncadd [#allocation4], 4294966272 }
 0x1f7   :  { %518 = vsyncpa [#allocation4], 1 }

// kernel: gcn_block_forward.3
= control target key start
LH: loop header
LB: loop body
LE: loop exit
PB: predicated region body
PF: predicated region fallthrough
CT: control target
= control target key end

     0   :  { %v919_v48 = vmov 0.0   ;;  %vm920_vm0 = vmmov 0   ;;  %s1088_s1 = inlined_call_operand.vmem [shape: bf16[128,128], index: 1, kind: input, shape index: {}]   ;;  %s1089_s0 = inlined_call_operand.vmem [shape: bf16[128,128], index: 0, kind: input, shape index: {}]   ;;  %s1090_s2 = inlined_call_operand.vmem [shape: bf16[128,128], index: 2, kind: input, shape index: {}]   ;;  %s1091_s3 = inlined_call_operand.vmem [shape: f32[1,128], index: 3, kind: input, shape index: {}]   ;;  %s1092_s5 = inlined_call_operand.vmem [shape: bf16[128,128], index: 5, kind: output, shape index: {0}]   ;;  %s1093_s4 = inlined_call_operand.vmem [shape: bf16[8,128], index: 4, kind: input, shape index: {}]   ;;  %s1094_s6 = inlined_call_operand.vmem [shape: f32[1,8,128], index: 6, kind: output, shape index: {1}]  }
   0x1   :  { %v895_v0 = vld [vmem:[%s1088_s1] sm:$0xff]   ;;  %v896_v1 = vld [vmem:[%s1088_s1 + $0x8] sm:$0xff]   ;;  %v897_v2 = vld [vmem:[%s1088_s1 + $0x10] sm:$0xff]  }
   0x2   :  { %809 = vmatprep.subr.bf16.mxu0 %v895_v0  ;;  %v898_v3 = vld [vmem:[%s1088_s1 + $0x18] sm:$0xff]   ;;  %v903_v4 = vld [vmem:[%s1089_s0] sm:$0xff]   ;;  %v900_v6 = vld [vmem:[%s1088_s1 + $0x28] sm:$0xff]  }
   0x3   :  { %810 = vmatpush3.bf16.msra.mxu0 %v895_v0  ;;  %825 = vmatprep.mubr.bf16.mxu0 %v903_v4  ;;  %v899_v5 = vld [vmem:[%s1088_s1 + $0x20] sm:$0xff]   ;;  %v912_v8 = vld [vmem:[%s1090_s2 + $0x8] sm:$0xff]   ;;  %v901_v9 = vld [vmem:[%s1088_s1 + $0x30] sm:$0xff]  }
   0x4   :  { %811 = vmatprep.subr.bf16.mxu0 %v896_v1  ;;  %v911_v7 = vld [vmem:[%s1090_s2] sm:$0xff]   ;;  %v913_v10 = vld [vmem:[%s1090_s2 + $0x10] sm:$0xff]   ;;  %v902_v11 = vld [vmem:[%s1088_s1 + $0x38] sm:$0xff]  }
   0x5   :  { %841 = vmatprep.subr.bf16.mxu1 %v911_v7  ;;  %v914_v12 = vld [vmem:[%s1090_s2 + $0x18] sm:$0xff]   ;;  %v915_v13 = vld [vmem:[%s1090_s2 + $0x20] sm:$0xff]   ;;  %v904_v14 = vld [vmem:[%s1089_s0 + $0x8] sm:$0xff]  }
   0x6   :  { %842 = vmatpush3.bf16.msra.mxu1 %v911_v7  ;;  %v905_v15 = vld [vmem:[%s1089_s0 + $0x10] sm:$0xff]   ;;  %v916_v16 = vld [vmem:[%s1090_s2 + $0x28] sm:$0xff]   ;;  %v906_v18 = vld [vmem:[%s1089_s0 + $0x18] sm:$0xff]  }
   0x7   :  { %812 = vmatpush3.bf16.msra.mxu0 %v896_v1  ;;  %843 = vmatprep.subr.bf16.mxu1 %v912_v8  ;;  %v917_v17 = vld [vmem:[%s1090_s2 + $0x30] sm:$0xff]   ;;  %v907_v19 = vld [vmem:[%s1089_s0 + $0x20] sm:$0xff]   ;;  %v908_v20 = vld [vmem:[%s1089_s0 + $0x28] sm:$0xff]  }
   0x8   :  { %813 = vmatprep.subr.bf16.mxu0 %v897_v2  ;;  %v909_v21 = vld [vmem:[%s1089_s0 + $0x30] sm:$0xff]   ;;  %v910_v22 = vld [vmem:[%s1089_s0 + $0x38] sm:$0xff]   ;;  %v1033_v49 = vld [vmem:[%s1091_s3] ss:$0 sm:$0xff] }
   0x9   :  { %v918_v23 = vld [vmem:[%s1090_s2 + $0x38] sm:$0xff]  }
   0xa   :  { %844 = vmatpush3.bf16.msra.mxu1 %v912_v8 }
   0xb   :  { %814 = vmatpush3.bf16.msra.mxu0 %v897_v2  ;;  %845 = vmatprep.subr.bf16.mxu1 %v913_v10 }
   0xc   :  { %815 = vmatprep.subr.bf16.mxu0 %v898_v3 }
   0xe   :  { %846 = vmatpush3.bf16.msra.mxu1 %v913_v10 }
   0xf   :  { %816 = vmatpush3.bf16.msra.mxu0 %v898_v3  ;;  %847 = vmatprep.subr.bf16.mxu1 %v914_v12 }
  0x10   :  { %817 = vmatprep.subr.bf16.mxu0 %v899_v5 }
  0x12   :  { %848 = vmatpush3.bf16.msra.mxu1 %v914_v12 }
  0x13   :  { %818 = vmatpush3.bf16.msra.mxu0 %v899_v5  ;;  %849 = vmatprep.subr.bf16.mxu1 %v915_v13 }
  0x14   :  { %819 = vmatprep.subr.bf16.mxu0 %v900_v6 }
  0x16   :  { %850 = vmatpush3.bf16.msra.mxu1 %v915_v13 }
  0x17   :  { %820 = vmatpush3.bf16.msra.mxu0 %v900_v6  ;;  %851 = vmatprep.subr.bf16.mxu1 %v916_v16 }
  0x18   :  { %821 = vmatprep.subr.bf16.mxu0 %v901_v9 }
  0x1a   :  { %852 = vmatpush3.bf16.msra.mxu1 %v916_v16 }
  0x1b   :  { %822 = vmatpush3.bf16.msra.mxu0 %v901_v9  ;;  %853 = vmatprep.subr.bf16.mxu1 %v917_v17 }
  0x1c   :  { %823 = vmatprep.subr.bf16.mxu0 %v902_v11 }
  0x1e   :  { %854 = vmatpush3.bf16.msra.mxu1 %v917_v17 }
  0x1f   :  { %824 = vmatpush3.bf16.msra.mxu0 %v902_v11  ;;  %855 = vmatprep.subr.bf16.mxu1 %v918_v23 }
  0x20   :  { %873 = vmatprep.subr.bf16.mxu0 %v919_v48 }
  0x22   :  { %826 = vmatmul.mubr.bf16.vlgmr.msra.gmra.mrb[0].mxu0 %v904_v14  ;;  %856 = vmatpush3.bf16.msra.mxu1 %v918_v23 }
  0x23   :  { %829 = vmatprep.mubr.bf16.mxu0 %v905_v15 }
  0x2a   :  { %830 = vmatmul.mubr.bf16.gmra.mrb[4].mxu0 %v906_v18 }
  0x2b   :  { %833 = vmatprep.mubr.bf16.mxu0 %v907_v19 }
  0x32   :  { %834 = vmatmul.mubr.bf16.gmra.mrb[8].mxu0 %v908_v20 }
  0x33   :  { %837 = vmatprep.mubr.bf16.mxu0 %v909_v21 }
  0x3a   :  { %838 = vmatmul.mubr.bf16.gmra.mrb[12].mxu0 %v910_v22 }
  0x3b   :  { %889 = vmatprep.mubr.msk.bf16.mxu0 %vm920_vm0, %v919_v48 }
  0xf5   :  { %v827_v24 = vpop.f32.mrb[0].mxu0 }
  0xf6   :  { %v226_v25 = vpop.f32.mrb[1].mxu0 }
  0xf7   :  { %v828_v26 = vpop.f32.mrb[2].mxu0 }
  0xf8   :  { %v341_v27 = vpack.c.bf16 %v828_v26, %v827_v24  ;;  %v229_v28 = vpop.f32.mrb[3].mxu0 }
  0xf9   :  { %v340_v29 = vpack.c.bf16 %v229_v28, %v226_v25 }
  0xfb   :  { %857 = vmatprep.mubr.bf16.mxu1 %v340_v29 }
  0xfc   :  { %858 = vmatmul.mubr.bf16.vlgmr.msra.gmra.mrb[0].mxu1 %v341_v27 }
  0xfd   :  { %v831_v30 = vpop.f32.mrb[4].mxu0 }
  0xfe   :  { %v242_v31 = vpop.f32.mrb[5].mxu0 }
  0xff   :  { %v832_v32 = vpop.f32.mrb[6].mxu0 }
 0x100   :  { %v343_v33 = vpack.c.bf16 %v832_v32, %v831_v30  ;;  %v245_v34 = vpop.f32.mrb[7].mxu0 }
 0x101   :  { %v342_v35 = vpack.c.bf16 %v245_v34, %v242_v31 }
 0x103   :  { %861 = vmatprep.mubr.bf16.mxu1 %v342_v35 }
 0x104   :  { %862 = vmatmul.mubr.bf16.gmra.mrb[4].mxu1 %v343_v33 }
 0x105   :  { %v835_v36 = vpop.f32.mrb[8].mxu0 }
 0x106   :  { %v258_v37 = vpop.f32.mrb[9].mxu0 }
 0x107   :  { %v836_v38 = vpop.f32.mrb[10].mxu0 }
 0x108   :  { %v345_v39 = vpack.c.bf16 %v836_v38, %v835_v36  ;;  %v261_v40 = vpop.f32.mrb[11].mxu0 }
 0x109   :  { %v344_v41 = vpack.c.bf16 %v261_v40, %v258_v37 }
 0x10b   :  { %865 = vmatprep.mubr.bf16.mxu1 %v344_v41 }
 0x10c   :  { %866 = vmatmul.mubr.bf16.gmra.mrb[8].mxu1 %v345_v39 }
 0x10d   :  { %v839_v42 = vpop.f32.mrb[12].mxu0 }
 0x10e   :  { %v274_v43 = vpop.f32.mrb[13].mxu0 }
 0x10f   :  { %v840_v44 = vpop.f32.mrb[14].mxu0 }
 0x110   :  { %v347_v45 = vpack.c.bf16 %v840_v44, %v839_v42  ;;  %v277_v46 = vpop.f32.mrb[15].mxu0  ;;  %v612_v42 = vld [vmem:[%s1093_s4] sm:$0xf] }
 0x111   :  { %v346_v47 = vpack.c.bf16 %v277_v46, %v274_v43 }
 0x113   :  { %869 = vmatprep.mubr.bf16.mxu1 %v346_v47 }
 0x114   :  { %870 = vmatmul.mubr.bf16.gmra.mrb[12].mxu1 %v347_v45 }
 0x1cf   :  { %v859_v50 = vpop.f32.mrb[0].mxu1 }
 0x1d0   :  { %v462_v51 = vadd.f32 %v859_v50, %v1033_v49  ;;  %v453_v52 = vpop.f32.mrb[1].mxu1 }
 0x1d1   :  { %v454_v53 = vadd.f32 %v1033_v49, %v453_v52  ;;  %v860_v54 = vpop.f32.mrb[2].mxu1 }
 0x1d2   :  { %v465_v55 = vadd.f32 %v860_v54, %v1033_v49  ;;  %v456_v56 = vpop.f32.mrb[3].mxu1  ;;  %v518_v58 = vmax.f32 %v462_v51, 0.0 }
 0x1d3   :  { %v457_v57 = vadd.f32 %v1033_v49, %v456_v56  ;;  %v516_v60 = vmax.f32 %v454_v53, 0.0 }
 0x1d4   :  { %v519_v59 = vmax.f32 %v465_v55, 0.0 }
 0x1d5   :  { %v517_v61 = vmax.f32 %v457_v57, 0.0 }
 0x1d6   :  { %v533_v62 = vpack.c.bf16 %v519_v59, %v518_v58 }
 0x1d7   :  { %v532_v63 = vpack.c.bf16 %v517_v61, %v516_v60  ;;  %v863_v0 = vpop.f32.mrb[4].mxu1 }
 0x1d8   :  { %761 = vst [vmem:[%s1092_s5 + $0x8] sm:$0xff] %v533_v62   ;;  %v478_v1 = vadd.f32 %v863_v0, %v1033_v49  ;;  %v469_v2 = vpop.f32.mrb[5].mxu1 }
 0x1d9   :  { %725 = vst [vmem:[%s1092_s5] sm:$0xff] %v532_v63   ;;  %v470_v3 = vadd.f32 %v1033_v49, %v469_v2  ;;  %v864_v4 = vpop.f32.mrb[6].mxu1  ;;  %874 = vmatpush3.bf16.msra.mxu0 %v532_v63 }
 0x1da   :  { %v481_v5 = vadd.f32 %v864_v4, %v1033_v49  ;;  %v472_v6 = vpop.f32.mrb[7].mxu1  ;;  %875 = vmatprep.subr.bf16.mxu0 %v919_v48  ;;  %v522_v8 = vmax.f32 %v478_v1, 0.0 }
 0x1db   :  { %v473_v7 = vadd.f32 %v1033_v49, %v472_v6  ;;  %v520_v10 = vmax.f32 %v470_v3, 0.0 }
 0x1dc   :  { %v523_v9 = vmax.f32 %v481_v5, 0.0 }
 0x1dd   :  { %v521_v11 = vmax.f32 %v473_v7, 0.0  ;;  %876 = vmatpush3.bf16.msra.mxu0 %v533_v62 }
 0x1de   :  { %v535_v12 = vpack.c.bf16 %v523_v9, %v522_v8  ;;  %877 = vmatprep.subr.bf16.mxu0 %v919_v48 }
 0x1df   :  { %v534_v13 = vpack.c.bf16 %v521_v11, %v520_v10  ;;  %v867_v14 = vpop.f32.mrb[8].mxu1 }
 0x1e0   :  { %763 = vst [vmem:[%s1092_s5 + $0x18] sm:$0xff] %v535_v12   ;;  %v494_v15 = vadd.f32 %v867_v14, %v1033_v49  ;;  %v485_v16 = vpop.f32.mrb[9].mxu1 }
 0x1e1   :  { %762 = vst [vmem:[%s1092_s5 + $0x10] sm:$0xff] %v534_v13   ;;  %v486_v17 = vadd.f32 %v1033_v49, %v485_v16  ;;  %v868_v18 = vpop.f32.mrb[10].mxu1  ;;  %878 = vmatpush3.bf16.msra.mxu0 %v534_v13 }
 0x1e2   :  { %v497_v19 = vadd.f32 %v868_v18, %v1033_v49  ;;  %v488_v20 = vpop.f32.mrb[11].mxu1  ;;  %879 = vmatprep.subr.bf16.mxu0 %v919_v48  ;;  %v526_v22 = vmax.f32 %v494_v15, 0.0 }
 0x1e3   :  { %v489_v21 = vadd.f32 %v1033_v49, %v488_v20  ;;  %v524_v24 = vmax.f32 %v486_v17, 0.0 }
 0x1e4   :  { %v527_v23 = vmax.f32 %v497_v19, 0.0 }
 0x1e5   :  { %v525_v25 = vmax.f32 %v489_v21, 0.0  ;;  %880 = vmatpush3.bf16.msra.mxu0 %v535_v12 }
 0x1e6   :  { %v537_v26 = vpack.c.bf16 %v527_v23, %v526_v22  ;;  %881 = vmatprep.subr.bf16.mxu0 %v919_v48 }
 0x1e7   :  { %v536_v27 = vpack.c.bf16 %v525_v25, %v524_v24  ;;  %v871_v28 = vpop.f32.mrb[12].mxu1 }
 0x1e8   :  { %765 = vst [vmem:[%s1092_s5 + $0x28] sm:$0xff] %v537_v26   ;;  %v510_v29 = vadd.f32 %v871_v28, %v1033_v49  ;;  %v501_v30 = vpop.f32.mrb[13].mxu1 }
 0x1e9   :  { %764 = vst [vmem:[%s1092_s5 + $0x20] sm:$0xff] %v536_v27   ;;  %v502_v31 = vadd.f32 %v1033_v49, %v501_v30  ;;  %v872_v32 = vpop.f32.mrb[14].mxu1  ;;  %882 = vmatpush3.bf16.msra.mxu0 %v536_v27 }
 0x1ea   :  { %v513_v33 = vadd.f32 %v872_v32, %v1033_v49  ;;  %v504_v34 = vpop.f32.mrb[15].mxu1  ;;  %883 = vmatprep.subr.bf16.mxu0 %v919_v48  ;;  %v530_v36 = vmax.f32 %v510_v29, 0.0 }
 0x1eb   :  { %v505_v35 = vadd.f32 %v1033_v49, %v504_v34  ;;  %v528_v38 = vmax.f32 %v502_v31, 0.0 }
 0x1ec   :  { %v531_v37 = vmax.f32 %v513_v33, 0.0 }
 0x1ed   :  { %v529_v39 = vmax.f32 %v505_v35, 0.0  ;;  %884 = vmatpush3.bf16.msra.mxu0 %v537_v26 }
 0x1ee   :  { %v539_v40 = vpack.c.bf16 %v531_v37, %v530_v36  ;;  %885 = vmatprep.subr.bf16.mxu0 %v919_v48 }
 0x1ef   :  { %v538_v41 = vpack.c.bf16 %v529_v39, %v528_v38 }
 0x1f0   :  { %767 = vst [vmem:[%s1092_s5 + $0x38] sm:$0xff] %v539_v40  }
 0x1f1   :  { %766 = vst [vmem:[%s1092_s5 + $0x30] sm:$0xff] %v538_v41   ;;  %886 = vmatpush3.bf16.msra.mxu0 %v538_v41 }
 0x1f2   :  { %887 = vmatprep.subr.bf16.mxu0 %v919_v48 }
 0x1f5   :  { %888 = vmatpush3.bf16.msra.mxu0 %v539_v40 }
 0x1f8   :  { %890 = vmatmul.mubr.bf16.vlgmr.msra.gmra.mrb[16].mxu0 %v612_v42 }
 0x2cb   :  { %v647_v43 = vpop.f32.mrb[16].mxu0 }
 0x2cc   :  { %653 = vst [vmem:[%s1094_s6] sm:$0xff] %v647_v43  ;;  %v891_v44 = vpop.f32.mrb[17].mxu0 }
 0x2cd   :  { %v650_v45 = vpop.f32.mrb[18].mxu0 }
 0x2ce   :  { %v892_v46 = vpop.f32.mrb[19].mxu0 }

</bundles_post_ra>
